<compile_context>
chip_gen: v7x
topology: tpu7x:2x2x1
jax: 0.10.0
libtpu: 0.0.40
codegen_flags: <defaults>
</compile_context>

<pallas_src>
import math
import functools

import jax
import jax.numpy as jnp
from jax.experimental import pallas as pl
from jax.experimental.pallas import tpu as pltpu


# ----------------------------------------------------------------------------
# Pallas kernel: the full decoder stack, grid = (batch, layer)
# ----------------------------------------------------------------------------
def decoder_stack_kernel(x_ref, pad_ref,
                         wq_ref, wk_ref, wv_ref, wo_ref, g1_ref, b1_ref,
                         w1_ref, w2_ref, g2_ref, b2_ref,
                         out_ref, attn_ref,
                         h_sc,
                         *, n_heads, d_k, d_v, eps=1e-5):
    l = pl.program_id(1)
    n_layers = pl.num_programs(1)

    # layer 0: seed the layer-resident hidden-state carry from the embeddings
    @pl.when(l == 0)
    def _():
        h_sc[...] = x_ref[0]

    h = h_sc[...]                                        # [S, D] f32
    S, D = h.shape
    hb = h.astype(jnp.bfloat16)
    hb3 = jnp.broadcast_to(hb[None], (n_heads, S, D))    # [H, S, D] (vreg bcast)

    # --- QKV projections: one batched MXU contraction each (bf16, f32 acc).
    #     1/sqrt(d_k) is already folded into wq host-side.
    qh = jnp.einsum('hsd,hde->hse', hb3, wq_ref[0],
                    preferred_element_type=jnp.float32)  # [H, S, d_k]
    kh = jnp.einsum('hsd,hde->hse', hb3, wk_ref[0],
                    preferred_element_type=jnp.float32)  # [H, S, d_k]
    vh = jnp.einsum('hsd,hde->hse', hb3, wv_ref[0],
                    preferred_element_type=jnp.float32)  # [H, S, d_v]

    # --- scores for all heads at once
    scores = jnp.einsum('hqe,hke->hqk',
                        qh.astype(jnp.bfloat16), kh.astype(jnp.bfloat16),
                        preferred_element_type=jnp.float32)   # [H, S, S]

    # --- mask built in-kernel: causal (iota) OR key padding ([1,S] row)
    row = jax.lax.broadcasted_iota(jnp.int32, (S, S), 0)
    col = jax.lax.broadcasted_iota(jnp.int32, (S, S), 1)
    masked = jnp.logical_or(col > row, pad_ref[0] > 0.0)      # [S, S]
    scores = jnp.where(masked[None, :, :], -1e9, scores)

    # --- softmax (f32; reciprocal on the EUP)
    m = jnp.max(scores, axis=-1, keepdims=True)
    e = jnp.exp(scores - m)
    denom = jnp.sum(e, axis=-1, keepdims=True)
    probs = e * pl.reciprocal(denom, approx=True)             # [H, S, S] f32
    attn_ref[...] = probs[None, None, :, :, :]

    # --- context and output projection (batched over heads, then head-sum)
    ctx = jnp.einsum('hqk,hkv->hqv',
                     probs.astype(jnp.bfloat16), vh.astype(jnp.bfloat16),
                     preferred_element_type=jnp.float32)      # [H, S, d_v]
    per_head_out = jnp.einsum('hqv,hvd->hqd',
                              ctx.astype(jnp.bfloat16), wo_ref[0],
                              preferred_element_type=jnp.float32)  # [H, S, D]
    attn_out = jnp.sum(per_head_out, axis=0)                  # [S, D]

    # --- residual + LayerNorm 1 (f32)
    y = attn_out + h
    mu = jnp.mean(y, axis=-1, keepdims=True)
    var = jnp.mean((y - mu) ** 2, axis=-1, keepdims=True)
    y = (y - mu) * jax.lax.rsqrt(var + eps) * g1_ref[0] + b1_ref[0]

    # --- position-wise FFN (bf16 matmuls, f32 acc) + residual + LayerNorm 2
    ff = jnp.dot(y.astype(jnp.bfloat16), w1_ref[0],
                 preferred_element_type=jnp.float32)
    ff = jnp.maximum(ff, 0.0)
    ff = jnp.dot(ff.astype(jnp.bfloat16), w2_ref[0],
                 preferred_element_type=jnp.float32)
    z = ff + y
    mu2 = jnp.mean(z, axis=-1, keepdims=True)
    var2 = jnp.mean((z - mu2) ** 2, axis=-1, keepdims=True)
    z = (z - mu2) * jax.lax.rsqrt(var2 + eps) * g2_ref[0] + b2_ref[0]

    # carry hidden state to the next layer; emit it on the last layer
    h_sc[...] = z

    @pl.when(l == n_layers - 1)
    def _():
        out_ref[...] = z[None]


# ----------------------------------------------------------------------------
# Parameter init (f32 master weights, same structure as before)
# ----------------------------------------------------------------------------
def init_decoder_params(key, *, d_model, n_heads, d_ff, d_k, d_v,
                        vocab_size, max_pos, n_layers):
    keys = jax.random.split(key, 2 + 6 * n_layers)
    scale = 0.02
    params = {
        "tok_emb": scale * jax.random.normal(keys[0], (vocab_size, d_model), jnp.float32),
        "pos_emb": scale * jax.random.normal(keys[1], (max_pos, d_model), jnp.float32),
        "layers": [],
    }
    ki = 2
    for _ in range(n_layers):
        lp = {
            "wq": scale * jax.random.normal(keys[ki + 0], (d_model, n_heads * d_k), jnp.float32),
            "wk": scale * jax.random.normal(keys[ki + 1], (d_model, n_heads * d_k), jnp.float32),
            "wv": scale * jax.random.normal(keys[ki + 2], (d_model, n_heads * d_v), jnp.float32),
            "wo": scale * jax.random.normal(keys[ki + 3], (n_heads * d_v, d_model), jnp.float32),
            "g1": jnp.ones((1, d_model), jnp.float32),
            "b1": jnp.zeros((1, d_model), jnp.float32),
            "w1": scale * jax.random.normal(keys[ki + 4], (d_model, d_ff), jnp.float32),
            "w2": scale * jax.random.normal(keys[ki + 5], (d_ff, d_model), jnp.float32),
            "g2": jnp.ones((1, d_model), jnp.float32),
            "b2": jnp.zeros((1, d_model), jnp.float32),
        }
        params["layers"].append(lp)
        ki += 6
    return params


# ----------------------------------------------------------------------------
# Decoder forward: embedding / pos-encoding / mask prep in JAX, stack in Pallas
# ----------------------------------------------------------------------------
def decoder_forward(params, inputs, attention_mask, *, n_heads, d_k, d_v):
    """inputs: int32 [B, S] token ids; attention_mask: int32 [B, S] (0 = pad)."""
    B, S = inputs.shape
    layers = params["layers"]
    L = len(layers)
    D = params["tok_emb"].shape[1]
    d_ff = layers[0]["w1"].shape[1]

    # embedding + learned positional encoding
    tok = jnp.take(params["tok_emb"], inputs, axis=0)               # [B, S, D]
    pos = jnp.take(params["pos_emb"], jnp.arange(S), axis=0)[None]  # [1, S, D]
    x = (tok + pos).astype(jnp.float32)

    # only key-padding info goes to the kernel ([B,1,S]); causal is in-kernel
    if attention_mask is not None:
        pad = (attention_mask == 0).astype(jnp.float32)[:, None, :]  # [B,1,S]
    else:
        pad = jnp.zeros((B, 1, S), jnp.float32)

    # --- stack per-layer weights, reshape to per-head layout, cast to bf16
    scale = 1.0 / math.sqrt(d_k)
    wq = (jnp.stack([lp["wq"] for lp in layers]) * scale)            # fold 1/sqrt(d_k)
    wq = wq.reshape(L, D, n_heads, d_k).transpose(0, 2, 1, 3).astype(jnp.bfloat16)
    wk = jnp.stack([lp["wk"] for lp in layers]).reshape(L, D, n_heads, d_k)
    wk = wk.transpose(0, 2, 1, 3).astype(jnp.bfloat16)               # [L,H,D,dk]
    wv = jnp.stack([lp["wv"] for lp in layers]).reshape(L, D, n_heads, d_v)
    wv = wv.transpose(0, 2, 1, 3).astype(jnp.bfloat16)               # [L,H,D,dv]
    wo = jnp.stack([lp["wo"] for lp in layers]).reshape(L, n_heads, d_v, D)
    wo = wo.astype(jnp.bfloat16)                                     # [L,H,dv,D]
    w1 = jnp.stack([lp["w1"] for lp in layers]).astype(jnp.bfloat16)  # [L,D,dff]
    w2 = jnp.stack([lp["w2"] for lp in layers]).astype(jnp.bfloat16)  # [L,dff,D]
    g1 = jnp.stack([lp["g1"] for lp in layers])                       # [L,1,D] f32
    b1 = jnp.stack([lp["b1"] for lp in layers])
    g2 = jnp.stack([lp["g2"] for lp in layers])
    b2 = jnp.stack([lp["b2"] for lp in layers])

    kernel = functools.partial(decoder_stack_kernel,
                               n_heads=n_heads, d_k=d_k, d_v=d_v)

    bmap3 = lambda b, l: (b, 0, 0)        # batch-indexed activations
    lmap3 = lambda b, l: (l, 0, 0)        # layer-indexed 3-D weights
    lmap4 = lambda b, l: (l, 0, 0, 0)     # layer-indexed 4-D (per-head) weights

    in_specs = [
        pl.BlockSpec((1, S, D), bmap3),                       # x
        pl.BlockSpec((1, 1, S), bmap3),                       # pad row
        pl.BlockSpec((1, n_heads, D, d_k), lmap4),            # wq
        pl.BlockSpec((1, n_heads, D, d_k), lmap4),            # wk
        pl.BlockSpec((1, n_heads, D, d_v), lmap4),            # wv
        pl.BlockSpec((1, n_heads, d_v, D), lmap4),            # wo
        pl.BlockSpec((1, 1, D), lmap3),                       # g1
        pl.BlockSpec((1, 1, D), lmap3),                       # b1
        pl.BlockSpec((1, D, d_ff), lmap3),                    # w1
        pl.BlockSpec((1, d_ff, D), lmap3),                    # w2
        pl.BlockSpec((1, 1, D), lmap3),                       # g2
        pl.BlockSpec((1, 1, D), lmap3),                       # b2
    ]
    out_specs = (
        pl.BlockSpec((1, S, D), bmap3),                                   # hidden
        pl.BlockSpec((1, 1, n_heads, S, S), lambda b, l: (l, b, 0, 0, 0)),  # attn
    )
    out_shape = (
        jax.ShapeDtypeStruct((B, S, D), jnp.float32),
        jax.ShapeDtypeStruct((L, B, n_heads, S, S), jnp.float32),
    )

    out, attn_all = pl.pallas_call(
        kernel,
        grid_spec=pltpu.PrefetchScalarGridSpec(
            num_scalar_prefetch=0,
            grid=(B, L),
            in_specs=in_specs,
            out_specs=out_specs,
            scratch_shapes=[pltpu.VMEM((S, D), jnp.float32)],   # hidden carry
        ),
        out_shape=out_shape,
        compiler_params=pltpu.CompilerParams(
            dimension_semantics=("parallel", "arbitrary")),
    )(x, pad, wq, wk, wv, wo, g1, b1, w1, w2, g2, b2)

    self_attns = [attn_all[l] for l in range(L)]
    return out, self_attns


# ----------------------------------------------------------------------------
# Pure-JAX reference (mirrors the kernel's bf16 operand rounding) for checking
# ----------------------------------------------------------------------------
def decoder_reference(params, inputs, attention_mask, *, n_heads, d_k, d_v, eps=1e-5):
    B, S = inputs.shape

    def r(a):  # mimic bf16 matmul-operand rounding
        return a.astype(jnp.bfloat16).astype(jnp.float32)

    tok = jnp.take(params["tok_emb"], inputs, axis=0)
    pos = jnp.take(params["pos_emb"], jnp.arange(S), axis=0)[None]
    h = (tok + pos).astype(jnp.float32)

    causal = jnp.triu(jnp.ones((S, S), jnp.int32), k=1).astype(bool)[None, None]
    if attention_mask is not None:
        padm = (attention_mask == 0)[:, None, None, :]
    else:
        padm = jnp.zeros((B, 1, 1, S), bool)
    mask = jnp.logical_or(causal, padm)                       # [B,1,S,S]

    scale = 1.0 / math.sqrt(d_k)
    attns = []
    for lp in params["layers"]:
        wq = r(lp["wq"] * scale); wk = r(lp["wk"]); wv = r(lp["wv"]); wo = r(lp["wo"])
        w1 = r(lp["w1"]); w2 = r(lp["w2"])
        hb = r(h)
        q = (hb @ wq).reshape(B, S, n_heads, d_k).transpose(0, 2, 1, 3)
        k = (hb @ wk).reshape(B, S, n_heads, d_k).transpose(0, 2, 1, 3)
        v = (hb @ wv).reshape(B, S, n_heads, d_v).transpose(0, 2, 1, 3)
        s = jnp.einsum('bhqd,bhkd->bhqk', r(q), r(k))
        s = jnp.where(mask, -1e9, s)
        p = jax.nn.softmax(s, axis=-1)
        attns.append(p)
        ctx = jnp.einsum('bhqk,bhkd->bhqd', r(p), r(v))
        ctx = ctx.transpose(0, 2, 1, 3).reshape(B, S, n_heads * d_v)
        y = r(ctx) @ wo + h
        mu = y.mean(-1, keepdims=True)
        var = ((y - mu) ** 2).mean(-1, keepdims=True)
        y = (y - mu) * jax.lax.rsqrt(var + eps) * lp["g1"] + lp["b1"]
        ff = jnp.maximum(r(y) @ w1, 0.0)
        ff = r(ff) @ w2
        z = ff + y
        mu2 = z.mean(-1, keepdims=True)
        var2 = ((z - mu2) ** 2).mean(-1, keepdims=True)
        h = (z - mu2) * jax.lax.rsqrt(var2 + eps) * lp["g2"] + lp["b2"]
    return h, attns


# ----------------------------------------------------------------------------
if __name__ == "__main__":
    # small config
    d_model, n_heads, d_ff, d_k, d_v = 32, 2, 64, 16, 16
    vocab_size, max_pos, n_layers = 50, 16, 2
    B, S = 2, 8

    key = jax.random.PRNGKey(0)
    kp, ki = jax.random.split(key)
    params = init_decoder_params(kp, d_model=d_model, n_heads=n_heads,
                                 d_ff=d_ff, d_k=d_k, d_v=d_v,
                                 vocab_size=vocab_size, max_pos=max_pos,
                                 n_layers=n_layers)

    inputs = jax.random.randint(ki, (B, S), 0, vocab_size, dtype=jnp.int32)
    # pad the last two positions of batch element 1
    attention_mask = jnp.array([[1, 1, 1, 1, 1, 1, 1, 1],
                                [1, 1, 1, 1, 1, 1, 0, 0]], dtype=jnp.int32)

    out, self_attns = decoder_forward(params, inputs, attention_mask,
                                      n_heads=n_heads, d_k=d_k, d_v=d_v)
    out = jax.block_until_ready(out)
    self_attns = [jax.block_until_ready(a) for a in self_attns]

    assert out.shape == (B, S, d_model)
    assert all(a.shape == (B, n_heads, S, S) for a in self_attns)
    assert bool(jnp.all(jnp.isfinite(out)))

    # correctness check against a pure-JAX reference of the same math
    ref_out, ref_attns = decoder_reference(params, inputs, attention_mask,
                                           n_heads=n_heads, d_k=d_k, d_v=d_v)
    ref_out = jax.block_until_ready(ref_out)
    assert float(jnp.max(jnp.abs(out - ref_out))) < 5e-2
    assert float(jnp.max(jnp.abs(self_attns[0] - ref_attns[0]))) < 5e-2

    print("KERNEL_OK")
</pallas_src>

<mosaic_0001>
module attributes {stable_mosaic.version = 11 : i64} {
  func.func @decoder_stack_kernel(%arg0: i32, %arg1: i32, %arg2: memref<1x8x32xf32, #tpu.memory_space<vmem>>, %arg3: memref<1x1x8xf32, #tpu.memory_space<vmem>>, %arg4: memref<1x2x32x16xbf16, #tpu.memory_space<vmem>>, %arg5: memref<1x2x32x16xbf16, #tpu.memory_space<vmem>>, %arg6: memref<1x2x32x16xbf16, #tpu.memory_space<vmem>>, %arg7: memref<1x2x16x32xbf16, #tpu.memory_space<vmem>>, %arg8: memref<1x1x32xf32, #tpu.memory_space<vmem>>, %arg9: memref<1x1x32xf32, #tpu.memory_space<vmem>>, %arg10: memref<1x32x64xbf16, #tpu.memory_space<vmem>>, %arg11: memref<1x64x32xbf16, #tpu.memory_space<vmem>>, %arg12: memref<1x1x32xf32, #tpu.memory_space<vmem>>, %arg13: memref<1x1x32xf32, #tpu.memory_space<vmem>>, %arg14: memref<1x8x32xf32, #tpu.memory_space<vmem>>, %arg15: memref<1x1x2x8x8xf32, #tpu.memory_space<vmem>>, %arg16: memref<8x32xf32, #tpu.memory_space<vmem>>) attributes {dimension_semantics = [#tpu.dimension_semantics<parallel>, #tpu.dimension_semantics<arbitrary>], iteration_bounds = array<i64: 2, 2>, scalar_prefetch = 0 : i64, scratch_operands = 1 : i64, tpu.core_type = #tpu.core_type<tc>, window_params = [{transform_indices = @transform_0, window_bounds = array<i64: 1, 8, 32>}, {transform_indices = @transform_1, window_bounds = array<i64: 1, 1, 8>}, {transform_indices = @transform_2, window_bounds = array<i64: 1, 2, 32, 16>}, {transform_indices = @transform_3, window_bounds = array<i64: 1, 2, 32, 16>}, {transform_indices = @transform_4, window_bounds = array<i64: 1, 2, 32, 16>}, {transform_indices = @transform_5, window_bounds = array<i64: 1, 2, 16, 32>}, {transform_indices = @transform_6, window_bounds = array<i64: 1, 1, 32>}, {transform_indices = @transform_7, window_bounds = array<i64: 1, 1, 32>}, {transform_indices = @transform_8, window_bounds = array<i64: 1, 32, 64>}, {transform_indices = @transform_9, window_bounds = array<i64: 1, 64, 32>}, {transform_indices = @transform_10, window_bounds = array<i64: 1, 1, 32>}, {transform_indices = @transform_11, window_bounds = array<i64: 1, 1, 32>}, {transform_indices = @transform_12, window_bounds = array<i64: 1, 8, 32>}, {transform_indices = @transform_13, window_bounds = array<i64: 1, 1, 2, 8, 8>}]} {
    %c0_i32 = arith.constant 0 : i32
    %0 = arith.cmpi eq, %arg1, %c0_i32 : i32
    %1 = arith.extui %0 : i1 to i32
    %c0_i32_0 = arith.constant 0 : i32
    %2 = arith.cmpi ne, %1, %c0_i32_0 : i32
    scf.if %2 {
      %c0_70 = arith.constant 0 : index
      %c0_71 = arith.constant 0 : index
      %c0_72 = arith.constant 0 : index
      %122 = vector.load %arg2[%c0_70, %c0_71, %c0_72] : memref<1x8x32xf32, #tpu.memory_space<vmem>>, vector<1x8x32xf32>
      %123 = vector.shape_cast %122 : vector<1x8x32xf32> to vector<8x32xf32>
      %c0_73 = arith.constant 0 : index
      %c0_74 = arith.constant 0 : index
      %124 = vector.load %arg16[%c0_73, %c0_74] : memref<8x32xf32, #tpu.memory_space<vmem>>, vector<8x32xf32>
      tpu.vector_store %arg16[%c0_73, %c0_74], %123 {strides = array<i32>} : memref<8x32xf32, #tpu.memory_space<vmem>>, vector<8x32xf32>,
    } else {
    }
    %c0 = arith.constant 0 : index
    %c0_1 = arith.constant 0 : index
    %3 = vector.load %arg16[%c0, %c0_1] : memref<8x32xf32, #tpu.memory_space<vmem>>, vector<8x32xf32>
    %4 = arith.truncf %3 : vector<8x32xf32> to vector<8x32xbf16>
    %5 = vector.shape_cast %4 : vector<8x32xbf16> to vector<1x8x32xbf16>
    %6 = vector.shape_cast %5 : vector<1x8x32xbf16> to vector<1x8x32xbf16>
    %7 = vector.broadcast %6 : vector<1x8x32xbf16> to vector<2x8x32xbf16>
    %c0_2 = arith.constant 0 : index
    %c0_3 = arith.constant 0 : index
    %c0_4 = arith.constant 0 : index
    %c0_5 = arith.constant 0 : index
    %8 = vector.load %arg4[%c0_2, %c0_3, %c0_4, %c0_5] : memref<1x2x32x16xbf16, #tpu.memory_space<vmem>>, vector<1x2x32x16xbf16>
    %9 = vector.shape_cast %8 : vector<1x2x32x16xbf16> to vector<2x32x16xbf16>
    "tpu.trace_start"() <{level = 10 : i32, message = "hsd,hde->hse"}> : () -> ()
    %cst = arith.constant dense<0.000000e+00> : vector<2x8x16xf32>
    %10 = tpu.matmul %7, %9, %cst {dimension_numbers = #tpu.dot_dimension_numbers<[2], [1], [1], [2], [0, 0, 0, 1, 1, 2], [0], [0]>} : vector<2x8x32xbf16>, vector<2x32x16xbf16>, vector<2x8x16xf32> -> vector<2x8x16xf32>
    "tpu.trace_stop"() : () -> ()
    %c0_6 = arith.constant 0 : index
    %c0_7 = arith.constant 0 : index
    %c0_8 = arith.constant 0 : index
    %c0_9 = arith.constant 0 : index
    %11 = vector.load %arg5[%c0_6, %c0_7, %c0_8, %c0_9] : memref<1x2x32x16xbf16, #tpu.memory_space<vmem>>, vector<1x2x32x16xbf16>
    %12 = vector.shape_cast %11 : vector<1x2x32x16xbf16> to vector<2x32x16xbf16>
    "tpu.trace_start"() <{level = 10 : i32, message = "hsd,hde->hse"}> : () -> ()
    %cst_10 = arith.constant dense<0.000000e+00> : vector<2x8x16xf32>
    %13 = tpu.matmul %7, %12, %cst_10 {dimension_numbers = #tpu.dot_dimension_numbers<[2], [1], [1], [2], [0, 0, 0, 1, 1, 2], [0], [0]>} : vector<2x8x32xbf16>, vector<2x32x16xbf16>, vector<2x8x16xf32> -> vector<2x8x16xf32>
    "tpu.trace_stop"() : () -> ()
    %c0_11 = arith.constant 0 : index
    %c0_12 = arith.constant 0 : index
    %c0_13 = arith.constant 0 : index
    %c0_14 = arith.constant 0 : index
    %14 = vector.load %arg6[%c0_11, %c0_12, %c0_13, %c0_14] : memref<1x2x32x16xbf16, #tpu.memory_space<vmem>>, vector<1x2x32x16xbf16>
    %15 = vector.shape_cast %14 : vector<1x2x32x16xbf16> to vector<2x32x16xbf16>
    "tpu.trace_start"() <{level = 10 : i32, message = "hsd,hde->hse"}> : () -> ()
    %cst_15 = arith.constant dense<0.000000e+00> : vector<2x8x16xf32>
    %16 = tpu.matmul %7, %15, %cst_15 {dimension_numbers = #tpu.dot_dimension_numbers<[2], [1], [1], [2], [0, 0, 0, 1, 1, 2], [0], [0]>} : vector<2x8x32xbf16>, vector<2x32x16xbf16>, vector<2x8x16xf32> -> vector<2x8x16xf32>
    "tpu.trace_stop"() : () -> ()
    %17 = arith.truncf %10 : vector<2x8x16xf32> to vector<2x8x16xbf16>
    %18 = arith.truncf %13 : vector<2x8x16xf32> to vector<2x8x16xbf16>
    "tpu.trace_start"() <{level = 10 : i32, message = "hqe,hke->hqk"}> : () -> ()
    %cst_16 = arith.constant dense<0.000000e+00> : vector<2x8x8xf32>
    %19 = tpu.matmul %17, %18, %cst_16 {dimension_numbers = #tpu.dot_dimension_numbers<[2], [2], [1], [1], [0, 0, 0, 1, 1, 1], [0], [0]>} : vector<2x8x16xbf16>, vector<2x8x16xbf16>, vector<2x8x8xf32> -> vector<2x8x8xf32>
    "tpu.trace_stop"() : () -> ()
    %20 = tpu.iota {dimensions = array<i32: 0>} : vector<8x8xi32>
    %21 = tpu.iota {dimensions = array<i32: 1>} : vector<8x8xi32>
    %22 = arith.cmpi sgt, %21, %20 : vector<8x8xi32>
    %c0_17 = arith.constant 0 : index
    %c0_18 = arith.constant 0 : index
    %c0_19 = arith.constant 0 : index
    %23 = vector.load %arg3[%c0_17, %c0_18, %c0_19] : memref<1x1x8xf32, #tpu.memory_space<vmem>>, vector<1x1x8xf32>
    %24 = vector.shape_cast %23 : vector<1x1x8xf32> to vector<1x8xf32>
    %cst_20 = arith.constant 0.000000e+00 : f32
    %25 = vector.broadcast %cst_20 : f32 to vector<1x8xf32>
    %26 = arith.cmpf ogt, %24, %25 : vector<1x8xf32>
    %27 = vector.broadcast %26 : vector<1x8xi1> to vector<8x8xi1>
    %28 = arith.ori %22, %27 : vector<8x8xi1>
    %29 = vector.shape_cast %28 : vector<8x8xi1> to vector<1x8x8xi1>
    %cst_21 = arith.constant -1.000000e+09 : f32
    %30 = vector.shape_cast %29 : vector<1x8x8xi1> to vector<1x8x8xi1>
    %31 = vector.broadcast %30 : vector<1x8x8xi1> to vector<2x8x8xi1>
    %32 = vector.broadcast %cst_21 : f32 to vector<2x8x8xf32>
    %33 = arith.select %31, %32, %19 : vector<2x8x8xi1>, vector<2x8x8xf32>
    %cst_22 = arith.constant dense<0xFF800000> : vector<2x8xf32>
    %34 = vector.multi_reduction <maximumf>, %33, %cst_22 [2] : vector<2x8x8xf32> to vector<2x8xf32>
    %35 = vector.shape_cast %34 : vector<2x8xf32> to vector<2x8x1xf32>
    %36 = vector.broadcast %35 : vector<2x8x1xf32> to vector<2x8x8xf32>
    %37 = arith.subf %33, %36 : vector<2x8x8xf32>
    %38 = math.exp %37 : vector<2x8x8xf32>
    %cst_23 = arith.constant dense<0.000000e+00> : vector<2x8xf32>
    %39 = vector.multi_reduction <add>, %38, %cst_23 [2] : vector<2x8x8xf32> to vector<2x8xf32>
    %40 = vector.shape_cast %39 : vector<2x8xf32> to vector<2x8x1xf32>
    %41 = tpu.reciprocal %40 {approx = true} : vector<2x8x1xf32> -> vector<2x8x1xf32>
    %42 = vector.broadcast %41 : vector<2x8x1xf32> to vector<2x8x8xf32>
    %43 = arith.mulf %38, %42 : vector<2x8x8xf32>
    %44 = vector.shape_cast %43 : vector<2x8x8xf32> to vector<1x1x2x8x8xf32>
    %c0_24 = arith.constant 0 : index
    %c0_25 = arith.constant 0 : index
    %c0_26 = arith.constant 0 : index
    %c0_27 = arith.constant 0 : index
    %c0_28 = arith.constant 0 : index
    %45 = vector.load %arg15[%c0_24, %c0_25, %c0_26, %c0_27, %c0_28] : memref<1x1x2x8x8xf32, #tpu.memory_space<vmem>>, vector<1x1x2x8x8xf32>
    tpu.vector_store %arg15[%c0_24, %c0_25, %c0_26, %c0_27, %c0_28], %44 {strides = array<i32>} : memref<1x1x2x8x8xf32, #tpu.memory_space<vmem>>, vector<1x1x2x8x8xf32>,
    %46 = arith.truncf %43 : vector<2x8x8xf32> to vector<2x8x8xbf16>
    %47 = arith.truncf %16 : vector<2x8x16xf32> to vector<2x8x16xbf16>
    "tpu.trace_start"() <{level = 10 : i32, message = "hqk,hkv->hqv"}> : () -> ()
    %cst_29 = arith.constant dense<0.000000e+00> : vector<2x8x16xf32>
    %48 = tpu.matmul %46, %47, %cst_29 {dimension_numbers = #tpu.dot_dimension_numbers<[2], [1], [1], [2], [0, 0, 0, 1, 1, 2], [0], [0]>} : vector<2x8x8xbf16>, vector<2x8x16xbf16>, vector<2x8x16xf32> -> vector<2x8x16xf32>
    "tpu.trace_stop"() : () -> ()
    %49 = arith.truncf %48 : vector<2x8x16xf32> to vector<2x8x16xbf16>
    %c0_30 = arith.constant 0 : index
    %c0_31 = arith.constant 0 : index
    %c0_32 = arith.constant 0 : index
    %c0_33 = arith.constant 0 : index
    %50 = vector.load %arg7[%c0_30, %c0_31, %c0_32, %c0_33] : memref<1x2x16x32xbf16, #tpu.memory_space<vmem>>, vector<1x2x16x32xbf16>
    %51 = vector.shape_cast %50 : vector<1x2x16x32xbf16> to vector<2x16x32xbf16>
    "tpu.trace_start"() <{level = 10 : i32, message = "hqv,hvd->hqd"}> : () -> ()
    %cst_34 = arith.constant dense<0.000000e+00> : vector<2x8x32xf32>
    %52 = tpu.matmul %49, %51, %cst_34 {dimension_numbers = #tpu.dot_dimension_numbers<[2], [1], [1], [2], [0, 0, 0, 1, 1, 2], [0], [0]>} : vector<2x8x16xbf16>, vector<2x16x32xbf16>, vector<2x8x32xf32> -> vector<2x8x32xf32>
    "tpu.trace_stop"() : () -> ()
    %cst_35 = arith.constant dense<0.000000e+00> : vector<8x32xf32>
    %53 = vector.multi_reduction <add>, %52, %cst_35 [0] : vector<2x8x32xf32> to vector<8x32xf32>
    %54 = arith.addf %53, %3 : vector<8x32xf32>
    %cst_36 = arith.constant dense<0.000000e+00> : vector<8xf32>
    %55 = vector.multi_reduction <add>, %54, %cst_36 [1] : vector<8x32xf32> to vector<8xf32>
    %56 = vector.shape_cast %55 : vector<8xf32> to vector<8x1xf32>
    %cst_37 = arith.constant 3.200000e+01 : f32
    %57 = vector.broadcast %cst_37 : f32 to vector<8x1xf32>
    %58 = arith.divf %56, %57 : vector<8x1xf32>
    %59 = vector.broadcast %58 : vector<8x1xf32> to vector<8x32xf32>
    %60 = arith.subf %54, %59 : vector<8x32xf32>
    %61 = arith.mulf %60, %60 : vector<8x32xf32>
    %cst_38 = arith.constant dense<0.000000e+00> : vector<8xf32>
    %62 = vector.multi_reduction <add>, %61, %cst_38 [1] : vector<8x32xf32> to vector<8xf32>
    %63 = vector.shape_cast %62 : vector<8xf32> to vector<8x1xf32>
    %cst_39 = arith.constant 3.200000e+01 : f32
    %64 = vector.broadcast %cst_39 : f32 to vector<8x1xf32>
    %65 = arith.divf %63, %64 : vector<8x1xf32>
    %66 = vector.broadcast %58 : vector<8x1xf32> to vector<8x32xf32>
    %67 = arith.subf %54, %66 : vector<8x32xf32>
    %cst_40 = arith.constant 9.99999974E-6 : f32
    %68 = vector.broadcast %cst_40 : f32 to vector<8x1xf32>
    %69 = arith.addf %65, %68 : vector<8x1xf32>
    %70 = math.rsqrt %69 : vector<8x1xf32>
    %71 = vector.broadcast %70 : vector<8x1xf32> to vector<8x32xf32>
    %72 = arith.mulf %67, %71 : vector<8x32xf32>
    %c0_41 = arith.constant 0 : index
    %c0_42 = arith.constant 0 : index
    %c0_43 = arith.constant 0 : index
    %73 = vector.load %arg8[%c0_41, %c0_42, %c0_43] : memref<1x1x32xf32, #tpu.memory_space<vmem>>, vector<1x1x32xf32>
    %74 = vector.shape_cast %73 : vector<1x1x32xf32> to vector<1x32xf32>
    %75 = vector.broadcast %74 : vector<1x32xf32> to vector<8x32xf32>
    %76 = arith.mulf %72, %75 : vector<8x32xf32>
    %c0_44 = arith.constant 0 : index
    %c0_45 = arith.constant 0 : index
    %c0_46 = arith.constant 0 : index
    %77 = vector.load %arg9[%c0_44, %c0_45, %c0_46] : memref<1x1x32xf32, #tpu.memory_space<vmem>>, vector<1x1x32xf32>
    %78 = vector.shape_cast %77 : vector<1x1x32xf32> to vector<1x32xf32>
    %79 = vector.broadcast %78 : vector<1x32xf32> to vector<8x32xf32>
    %80 = arith.addf %76, %79 : vector<8x32xf32>
    %81 = arith.truncf %80 : vector<8x32xf32> to vector<8x32xbf16>
    %c0_47 = arith.constant 0 : index
    %c0_48 = arith.constant 0 : index
    %c0_49 = arith.constant 0 : index
    %82 = vector.load %arg10[%c0_47, %c0_48, %c0_49] : memref<1x32x64xbf16, #tpu.memory_space<vmem>>, vector<1x32x64xbf16>
    %83 = vector.shape_cast %82 : vector<1x32x64xbf16> to vector<32x64xbf16>
    %cst_50 = arith.constant dense<0.000000e+00> : vector<8x64xf32>
    %84 = tpu.matmul %81, %83, %cst_50 {dimension_numbers = #tpu.dot_dimension_numbers<[1], [0], [0], [1], [0, 0, 1, 1], [], []>} : vector<8x32xbf16>, vector<32x64xbf16>, vector<8x64xf32> -> vector<8x64xf32>
    %cst_51 = arith.constant 0.000000e+00 : f32
    %85 = vector.broadcast %cst_51 : f32 to vector<8x64xf32>
    %86 = arith.maximumf %84, %85 : vector<8x64xf32>
    %87 = arith.truncf %86 : vector<8x64xf32> to vector<8x64xbf16>
    %c0_52 = arith.constant 0 : index
    %c0_53 = arith.constant 0 : index
    %c0_54 = arith.constant 0 : index
    %88 = vector.load %arg11[%c0_52, %c0_53, %c0_54] : memref<1x64x32xbf16, #tpu.memory_space<vmem>>, vector<1x64x32xbf16>
    %89 = vector.shape_cast %88 : vector<1x64x32xbf16> to vector<64x32xbf16>
    %cst_55 = arith.constant dense<0.000000e+00> : vector<8x32xf32>
    %90 = tpu.matmul %87, %89, %cst_55 {dimension_numbers = #tpu.dot_dimension_numbers<[1], [0], [0], [1], [0, 0, 1, 1], [], []>} : vector<8x64xbf16>, vector<64x32xbf16>, vector<8x32xf32> -> vector<8x32xf32>
    %91 = arith.addf %90, %80 : vector<8x32xf32>
    %cst_56 = arith.constant dense<0.000000e+00> : vector<8xf32>
    %92 = vector.multi_reduction <add>, %91, %cst_56 [1] : vector<8x32xf32> to vector<8xf32>
    %93 = vector.shape_cast %92 : vector<8xf32> to vector<8x1xf32>
    %cst_57 = arith.constant 3.200000e+01 : f32
    %94 = vector.broadcast %cst_57 : f32 to vector<8x1xf32>
    %95 = arith.divf %93, %94 : vector<8x1xf32>
    %96 = vector.broadcast %95 : vector<8x1xf32> to vector<8x32xf32>
    %97 = arith.subf %91, %96 : vector<8x32xf32>
    %98 = arith.mulf %97, %97 : vector<8x32xf32>
    %cst_58 = arith.constant dense<0.000000e+00> : vector<8xf32>
    %99 = vector.multi_reduction <add>, %98, %cst_58 [1] : vector<8x32xf32> to vector<8xf32>
    %100 = vector.shape_cast %99 : vector<8xf32> to vector<8x1xf32>
    %cst_59 = arith.constant 3.200000e+01 : f32
    %101 = vector.broadcast %cst_59 : f32 to vector<8x1xf32>
    %102 = arith.divf %100, %101 : vector<8x1xf32>
    %103 = vector.broadcast %95 : vector<8x1xf32> to vector<8x32xf32>
    %104 = arith.subf %91, %103 : vector<8x32xf32>
    %cst_60 = arith.constant 9.99999974E-6 : f32
    %105 = vector.broadcast %cst_60 : f32 to vector<8x1xf32>
    %106 = arith.addf %102, %105 : vector<8x1xf32>
    %107 = math.rsqrt %106 : vector<8x1xf32>
    %108 = vector.broadcast %107 : vector<8x1xf32> to vector<8x32xf32>
    %109 = arith.mulf %104, %108 : vector<8x32xf32>
    %c0_61 = arith.constant 0 : index
    %c0_62 = arith.constant 0 : index
    %c0_63 = arith.constant 0 : index
    %110 = vector.load %arg12[%c0_61, %c0_62, %c0_63] : memref<1x1x32xf32, #tpu.memory_space<vmem>>, vector<1x1x32xf32>
    %111 = vector.shape_cast %110 : vector<1x1x32xf32> to vector<1x32xf32>
    %112 = vector.broadcast %111 : vector<1x32xf32> to vector<8x32xf32>
    %113 = arith.mulf %109, %112 : vector<8x32xf32>
    %c0_64 = arith.constant 0 : index
    %c0_65 = arith.constant 0 : index
    %c0_66 = arith.constant 0 : index
    %114 = vector.load %arg13[%c0_64, %c0_65, %c0_66] : memref<1x1x32xf32, #tpu.memory_space<vmem>>, vector<1x1x32xf32>
    %115 = vector.shape_cast %114 : vector<1x1x32xf32> to vector<1x32xf32>
    %116 = vector.broadcast %115 : vector<1x32xf32> to vector<8x32xf32>
    %117 = arith.addf %113, %116 : vector<8x32xf32>
    %c0_67 = arith.constant 0 : index
    %c0_68 = arith.constant 0 : index
    %118 = vector.load %arg16[%c0_67, %c0_68] : memref<8x32xf32, #tpu.memory_space<vmem>>, vector<8x32xf32>
    tpu.vector_store %arg16[%c0_67, %c0_68], %117 {strides = array<i32>} : memref<8x32xf32, #tpu.memory_space<vmem>>, vector<8x32xf32>,
    %c1_i32 = arith.constant 1 : i32
    %119 = arith.cmpi eq, %arg1, %c1_i32 : i32
    %120 = arith.extui %119 : i1 to i32
    %c0_i32_69 = arith.constant 0 : i32
    %121 = arith.cmpi ne, %120, %c0_i32_69 : i32
    scf.if %121 {
      %122 = vector.shape_cast %117 : vector<8x32xf32> to vector<1x8x32xf32>
      %c0_70 = arith.constant 0 : index
      %c0_71 = arith.constant 0 : index
      %c0_72 = arith.constant 0 : index
      %123 = vector.load %arg14[%c0_70, %c0_71, %c0_72] : memref<1x8x32xf32, #tpu.memory_space<vmem>>, vector<1x8x32xf32>
      tpu.vector_store %arg14[%c0_70, %c0_71, %c0_72], %122 {strides = array<i32>} : memref<1x8x32xf32, #tpu.memory_space<vmem>>, vector<1x8x32xf32>,
    } else {
    }
    return
  }
  func.func @transform_0(%arg0: i32, %arg1: i32) -> (i32, i32, i32) {
    %c0_i32 = arith.constant 0 : i32
    %c0_i32_0 = arith.constant 0 : i32
    %c0_i32_1 = arith.constant 0 : i32
    return %arg0, %c0_i32, %c0_i32_0 : i32, i32, i32
  }
  func.func @transform_1(%arg0: i32, %arg1: i32) -> (i32, i32, i32) {
    %c0_i32 = arith.constant 0 : i32
    %c0_i32_0 = arith.constant 0 : i32
    %c0_i32_1 = arith.constant 0 : i32
    return %arg0, %c0_i32, %c0_i32_0 : i32, i32, i32
  }
  func.func @transform_2(%arg0: i32, %arg1: i32) -> (i32, i32, i32, i32) {
    %c0_i32 = arith.constant 0 : i32
    %c0_i32_0 = arith.constant 0 : i32
    %c0_i32_1 = arith.constant 0 : i32
    %c0_i32_2 = arith.constant 0 : i32
    return %arg1, %c0_i32, %c0_i32_0, %c0_i32_1 : i32, i32, i32, i32
  }
  func.func @transform_3(%arg0: i32, %arg1: i32) -> (i32, i32, i32, i32) {
    %c0_i32 = arith.constant 0 : i32
    %c0_i32_0 = arith.constant 0 : i32
    %c0_i32_1 = arith.constant 0 : i32
    %c0_i32_2 = arith.constant 0 : i32
    return %arg1, %c0_i32, %c0_i32_0, %c0_i32_1 : i32, i32, i32, i32
  }
  func.func @transform_4(%arg0: i32, %arg1: i32) -> (i32, i32, i32, i32) {
    %c0_i32 = arith.constant 0 : i32
    %c0_i32_0 = arith.constant 0 : i32
    %c0_i32_1 = arith.constant 0 : i32
    %c0_i32_2 = arith.constant 0 : i32
    return %arg1, %c0_i32, %c0_i32_0, %c0_i32_1 : i32, i32, i32, i32
  }
  func.func @transform_5(%arg0: i32, %arg1: i32) -> (i32, i32, i32, i32) {
    %c0_i32 = arith.constant 0 : i32
    %c0_i32_0 = arith.constant 0 : i32
    %c0_i32_1 = arith.constant 0 : i32
    %c0_i32_2 = arith.constant 0 : i32
    return %arg1, %c0_i32, %c0_i32_0, %c0_i32_1 : i32, i32, i32, i32
  }
  func.func @transform_6(%arg0: i32, %arg1: i32) -> (i32, i32, i32) {
    %c0_i32 = arith.constant 0 : i32
    %c0_i32_0 = arith.constant 0 : i32
    %c0_i32_1 = arith.constant 0 : i32
    return %arg1, %c0_i32, %c0_i32_0 : i32, i32, i32
  }
  func.func @transform_7(%arg0: i32, %arg1: i32) -> (i32, i32, i32) {
    %c0_i32 = arith.constant 0 : i32
    %c0_i32_0 = arith.constant 0 : i32
    %c0_i32_1 = arith.constant 0 : i32
    return %arg1, %c0_i32, %c0_i32_0 : i32, i32, i32
  }
  func.func @transform_8(%arg0: i32, %arg1: i32) -> (i32, i32, i32) {
    %c0_i32 = arith.constant 0 : i32
    %c0_i32_0 = arith.constant 0 : i32
    %c0_i32_1 = arith.constant 0 : i32
    return %arg1, %c0_i32, %c0_i32_0 : i32, i32, i32
  }
  func.func @transform_9(%arg0: i32, %arg1: i32) -> (i32, i32, i32) {
    %c0_i32 = arith.constant 0 : i32
    %c0_i32_0 = arith.constant 0 : i32
    %c0_i32_1 = arith.constant 0 : i32
    return %arg1, %c0_i32, %c0_i32_0 : i32, i32, i32
  }
  func.func @transform_10(%arg0: i32, %arg1: i32) -> (i32, i32, i32) {
    %c0_i32 = arith.constant 0 : i32
    %c0_i32_0 = arith.constant 0 : i32
    %c0_i32_1 = arith.constant 0 : i32
    return %arg1, %c0_i32, %c0_i32_0 : i32, i32, i32
  }
  func.func @transform_11(%arg0: i32, %arg1: i32) -> (i32, i32, i32) {
    %c0_i32 = arith.constant 0 : i32
    %c0_i32_0 = arith.constant 0 : i32
    %c0_i32_1 = arith.constant 0 : i32
    return %arg1, %c0_i32, %c0_i32_0 : i32, i32, i32
  }
  func.func @transform_12(%arg0: i32, %arg1: i32) -> (i32, i32, i32) {
    %c0_i32 = arith.constant 0 : i32
    %c0_i32_0 = arith.constant 0 : i32
    %c0_i32_1 = arith.constant 0 : i32
    return %arg0, %c0_i32, %c0_i32_0 : i32, i32, i32
  }
  func.func @transform_13(%arg0: i32, %arg1: i32) -> (i32, i32, i32, i32, i32) {
    %c0_i32 = arith.constant 0 : i32
    %c0_i32_0 = arith.constant 0 : i32
    %c0_i32_1 = arith.constant 0 : i32
    %c0_i32_2 = arith.constant 0 : i32
    return %arg1, %arg0, %c0_i32, %c0_i32_0, %c0_i32_1 : i32, i32, i32, i32, i32
  }
}

</mosaic_0001>

<bundles_post_ra>
// kernel: tpu_custom_call.1
= control target key start
LH: loop header
LB: loop body
LE: loop exit
PB: predicated region body
PF: predicated region fallthrough
CT: control target
= control target key end

     0   :  { %s2817_s0 = inlined_call_operand.vmem [shape: f32[2,8,32], index: 0, kind: input, shape index: {}]   ;;  %s2818_s1 = inlined_call_operand.vmem [shape: f32[2,1,8], index: 1, kind: input, shape index: {}]   ;;  %s2819_s2 = inlined_call_operand.vmem [shape: bf16[2,2,32,16], index: 2, kind: input, shape index: {}]   ;;  %s2820_s3 = inlined_call_operand.vmem [shape: bf16[2,2,32,16], index: 3, kind: input, shape index: {}]   ;;  %s2821_s4 = inlined_call_operand.vmem [shape: bf16[2,2,32,16], index: 4, kind: input, shape index: {}]   ;;  %s2822_s5 = inlined_call_operand.vmem [shape: bf16[2,2,16,32], index: 5, kind: input, shape index: {}]   ;;  %s2823_s6 = inlined_call_operand.vmem [shape: f32[2,1,32], index: 6, kind: input, shape index: {}]   ;;  %s2824_s7 = inlined_call_operand.vmem [shape: f32[2,1,32], index: 7, kind: input, shape index: {}]   ;;  %s2825_s8 = inlined_call_operand.vmem [shape: bf16[2,32,64], index: 8, kind: input, shape index: {}]   ;;  %s2826_s9 = inlined_call_operand.vmem [shape: bf16[2,64,32], index: 9, kind: input, shape index: {}]   ;;  %s2827_s10 = inlined_call_operand.vmem [shape: f32[2,1,32], index: 10, kind: input, shape index: {}]   ;;  %s2828_s11 = inlined_call_operand.vmem [shape: f32[2,1,32], index: 11, kind: input, shape index: {}]   ;;  %s2829_s12 = inlined_call_operand.hbm [shape: f32[2,8,32], index: 12, kind: output, shape index: {0}]   ;;  %s2830_s13 = inlined_call_operand.hbm [shape: f32[2,2,2,8,8], index: 13, kind: output, shape index: {1}]  }
   0x1   :  { %2856 = sst [smem:[#allocation28_spill]] %s2817_s0 }
   0x2   :  { %2857 = sst [smem:[#allocation29_spill]] %s2818_s1 }
   0x3   :  { %2858 = sst [smem:[#allocation30_spill]] %s2819_s2 }
   0x4   :  { %2859 = sst [smem:[#allocation31_spill]] %s2820_s3 }
   0x5   :  { %2860 = sst [smem:[#allocation32_spill]] %s2821_s4 }
   0x6   :  { %2861 = sst [smem:[#allocation33_spill]] %s2822_s5 }
   0x7   :  { %2862 = sst [smem:[#allocation34_spill]] %s2823_s6 }
   0x8   :  { %2863 = sst [smem:[#allocation35_spill]] %s2826_s9 }
   0x9   :  { %2864 = sst [smem:[#allocation36_spill]] %s2827_s10 }
   0xa   :  { %2865 = sst [smem:[#allocation37_spill]] %s2828_s11 }
   0xb   :  { %2866 = sst [smem:[#allocation38_spill]] %s2829_s12 }
   0xc   :  { %2867 = sst [smem:[#allocation39_spill]] %s2830_s13 }
   0xd   :  { %19 = vsyncpa [#allocation4], 0 }
   0xe   :  { %21 = vsyncpa [#allocation4 + $0x1], 0 }
   0xf   :  { %22 = vsyncpa [#allocation6], 0 }
  0x10   :  { %24 = vsyncpa [#allocation6 + $0x1], 0  ;;  %s2390_s25 = smov 0   ;;  %s2392_s26 = smov 0  }
  0x11   :  { %s2394_s27 = smov 0   ;;  %s2396_s28 = smov 0  }
  0x12   :  { %s2398_s29 = smov 0   ;;  %s2400_s30 = smov 0  }
  0x13   :  { %s2402_s14 = smov 0   ;;  %s2404_s15 = smov 0  }
  0x14   :  { %s2406_s16 = smov 0   ;;  %s2408_s17 = smov 0  }
  0x15   :  { %s2410_s18 = smov 0  }
  0x16 LB: > { %2868 = sst [smem:[#allocation9_spill]] %s2271_s25  ;;  %s1808_s19 = sadd.s32 4294967295, %s2311_s18   ;;  %s2311_s18 = sphi %s2410_s18, %s30_s18   ;;  %s2307_s17 = sphi %s2408_s17, %s2933_s17   ;;  %s2303_s16 = sphi %s2406_s16, %s2932_s16   ;;  %s2299_s15 = sphi %s2404_s15, %s2931_s15   ;;  %s2295_s14 = sphi %s2402_s14, %s2930_s14   ;;  %s2291_s30 = sphi %s2400_s30, %s2929_s30   ;;  %s2287_s29 = sphi %s2398_s29, %s2928_s29   ;;  %s2283_s28 = sphi %s2396_s28, %s2927_s28   ;;  %s2279_s27 = sphi %s2394_s27, %s2926_s27   ;;  %s2275_s26 = sphi %s2392_s26, %s2925_s26   ;;  %s2271_s25 = sphi %s2390_s25, %s2924_s25  }
  0x17   : > { %2869 = sst [smem:[#allocation10_spill]] %s2275_s26  ;;  %s1809_s20 = sadd.s32 4294967294, %s2311_s18  }
  0x18   : > { %2870 = sst [smem:[#allocation11_spill]] %s2279_s27  ;;  %s39_s21 = sadd.s32 1, %s2303_s16 }
  0x19   : > { %2871 = sst [smem:[#allocation12_spill]] %s2283_s28  ;;  %s42_s22 = sadd.s32 1, %s2307_s17 }
  0x1a   : > { %2872 = sst [smem:[#allocation13_spill]] %s2287_s29  ;;  %p40_p0 = scmp.ge.s32.totalorder %s39_s21, 2 }
  0x1b   : > { %2873 = sst [smem:[#allocation14_spill]] %s2291_s30  ;;  %s361_s23 = sadd.s32 1, %s2291_s30 }
  0x1c   : > { %2874 = sst [smem:[#allocation15_spill]] %s2299_s15  ;;  %p371_p1 = scmp.ne.s32.totalorder %s2291_s30, %s2287_s29 }
  0x1d   : > { %2875 = sst [smem:[#allocation16_spill]] %s2303_s16  ;;  %p2452_p2 = scmp.eq.s32.totalorder %s1808_s19, 3 }
  0x1e   : > { %2876 = sst [smem:[#allocation17_spill]] %s2307_s17  ;;  %s2935_s21 = smov (%p40_p0, %s39_s21), 0 }
  0x1f   : > { %2877 = sst [smem:[#allocation18_spill]] %s2311_s18  ;;  %s2937_s22 = smov (!%p40_p0, %s42_s22), %s2307_s17 }
  0x20   : > { %2879 = sst [smem:[#allocation19_spill]] %s2935_s21  ;;  %p2461_p3 = por %p2452_p2, %p371_p1 }
  0x21   : > { %p377_p4 = scmp.ne.s32.totalorder %s2287_s29, %s2283_s28  ;;  %p44_p5 = scmp.ge.s32.totalorder %s2937_s22, 2 }
  0x22   : > { %s2880_s13 = scalar_select %p2461_p3, 1, 0 }
  0x23   : > { %p2467_p6 = scmp.eq.s32.totalorder %s1809_s20, 3  ;;  %s384_s12 = ssub.s32 %s2303_s16, %s2935_s21 }
  0x24   : > { %2881 = sst [smem:[#allocation20_spill]] %s2880_s13  ;;  %s389_s11 = sadd.s32 1, %s2279_s27 }
  0x25   : > { %s2939_s22 = smov (%p44_p5, %s2937_s22), 0  ;;  %p2478_p7 = por %p2467_p6, %p377_p4 }
  0x26   : > { %2883 = sst [smem:[#allocation21_spill]] %s2939_s22  ;;  %p399_p8 = scmp.ne.s32.totalorder %s2279_s27, %s2275_s26 }
  0x27   : > { %s2884_s10 = scalar_select %p2478_p7, 1, 0 }
  0x28   : > { %s358_s28 = ssub.s32 %s2307_s17, %s2939_s22  ;;  %p405_p9 = scmp.ne.s32.totalorder %s2275_s26, %s2271_s25 }
  0x29   : > { %2885 = sst [smem:[#allocation22_spill]] %s2884_s10  ;;  %p359_p10 = scmp.eq.s32.totalorder %s358_s28, 0 }
  0x2a   : > { %s386_s20 = sor.u32 %s384_s12, %s358_s28  ;;  %p2490_p12 = por %p399_p8, %p2452_p2 }
  0x2b   : > { %p387_p11 = scmp.eq.s32.totalorder %s386_s20, 0  ;;  %p2502_p13 = por %p405_p9, %p2467_p6 }
  0x2c   : > { %s2886_s13 = scalar_select %p2490_p12, 1, 0 }
  0x2d   : > { %s2495_s21 = scalar_select %p359_p10, %s2291_s30, %s361_s23  }
  0x2e   : > { %2887 = sst [smem:[#allocation23_spill]] %s2886_s13  ;;  %p1812_p0 = scmp.ge.s32.totalorder %s2311_s18, 1 }
  0x2f   : > { %2888 = sst [smem:[#allocation24_spill]] %s2495_s21  ;;  %p509_p1 = scmp.lt.s32.totalorder %s2311_s18, 5 }
  0x30   : > { %s2498_s16 = scalar_select %p387_p11, %s2279_s27, %s389_s11  }
  0x31   : > { %s2890_s9 = scalar_select %p2502_p13, 1, 0 }
  0x32   : > { %2889 = sst [smem:[#allocation25_spill]] %s2498_s16  ;;  %p510_p4 = pnand %p1812_p0, %p509_p1 }
  0x33   : > { %2891 = sst [smem:[#allocation26_spill]] %s2890_s9 }
  0x34   : > { %513 = sbr.rel (%p510_p4) target bundleno = 2399 (0x95f), region = 68 }
  0x3b   : > { %s2838_s12 = sand.u32 1, %s2287_s29   ;;  %s2840_s11 = sand.u32 1, %s2275_s26  }
  0x3c   : > { %s2512_s28 = sshll.u32 %s2838_s12, 3  ;;  %s1814_s23 = sshll.u32 %s2840_s11, 4 }
  0x3d   : > { %p602_p2 = scmp.lt.s32.totalorder %s2299_s15, 1  ;;  %p609_p5 = scmp.lt.s32.totalorder %s2295_s14, 1 }
  0x3e   : > { %s2893_s0 = sld [smem:[#allocation28_spill]]  ;;  %s2894_s2 = sld [smem:[#allocation30_spill]] }
  0x3f   : > { %s2519_s24 = scalar_select %p602_p2, %s2299_s15, 1 }
  0x40   : > { %s2522_s19 = scalar_select %p609_p5, %s2295_s14, 1 }
  0x41   : > { %s1815_s20 = sshll.u32 %s2519_s24, 3  ;;  %s2895_s3 = sld [smem:[#allocation31_spill]] }
  0x42   : > { %s1876_s16 = sshll.u32 %s2522_s19, 5  ;;  %s2896_s4 = sld [smem:[#allocation32_spill]] }
  0x43   : > { %s1879_s22 = sshll.u32 %s2522_s19, 4  ;;  %s2897_s5 = sld [smem:[#allocation33_spill]] }
  0x44   : > { %s605_s30 = scalar_lea.vmem %s2893_s0, %s1815_s20  ;;  %s613_s25 = scalar_lea.vmem %s2894_s2, %s1876_s16 }
  0x45   : > { %s634_s10 = scalar_lea.vmem %s2824_s7, %s2522_s19  ;;  %s2563_s26 = scalar_lea.vmem %s2825_s8, %s1879_s22 }
  0x46   : > { %s2902_s9 = sld [smem:[#allocation37_spill]]  ;;  %s594_s0 = scalar_lea.vmem [#allocation3], %s2512_s28 }
  0x47   : > { %s2539_s13 = scalar_lea.vmem %s2895_s3, %s1876_s16  ;;  %s2579_s27 = scalar_lea.vmem [#allocation5], %s1814_s23 }
  0x48   : > { %s2544_s15 = scalar_lea.vmem %s2896_s4, %s1876_s16  ;;  %s2900_s4 = sld [smem:[#allocation35_spill]] }
  0x49   : > { %s2550_s17 = scalar_lea.vmem %s2897_s5, %s1879_s22  ;;  %s2901_s5 = sld [smem:[#allocation36_spill]] }
  0x4a   : > { %2898 = sst [smem:[#allocation27_spill]] %s2550_s17  ;;  %p1828_p6 = scmp.ne.s32.totalorder %s2295_s14, 0 }
  0x4b   : > { %v656_v0 = vld [vmem:[%s605_s30] sm:$0xff] (!%p1828_p6)  ;;  %vm657_vm0 = vcmask (!%p1828_p6), 261120  }
  0x4c   : > { %s650_s6 = scalar_lea.vmem %s2902_s9, %s2522_s19  ;;  %655 = sbr.rel (%p1828_p6) target bundleno = 83 (0x53), region = 72  ;;  %658 = vst.msk [vmem:[#allocation2] sm:$0xff] (!%p1828_p6), %vm657_vm0, %v656_v0 }
  0x4e   : > { %s2568_s1 = scalar_lea.vmem %s2900_s4, %s1876_s16 }
  0x4f   : > { %s647_s17 = scalar_lea.vmem %s2901_s5, %s2522_s19 }
  0x53 PF: > { %v2129_v1 = vld [vmem:[%s613_s25] sm:$0xff]   ;;  %v2313_v2 = vmov 0.0   ;;  %v2130_v3 = vld [vmem:[%s613_s25 + $0x10] sm:$0xff]   ;;  %v2131_v4 = vld [vmem:[%s613_s25 + $0x8] sm:$0xff]   ;;  %vm2314_vm1 = vmmov 0   ;;  %vm681_vm2 = vcmask 261120   ;;  %v1098_v50 = vlaneseq }
  0x54   : > { %1920 = vmatprep.subr.bf16.mxu0 %v2313_v2  ;;  %1928 = vmatprep.subr.bf16.mxu1 %v2313_v2  ;;  %v2132_v5 = vld [vmem:[%s613_s25 + $0x18] sm:$0xff]   ;;  %v2590_v6 = vld [vmem:[#allocation2] sm:$0xff]  ;;  %v2134_v9 = vld [vmem:[%s2539_s13 + $0x10] sm:$0xff]   ;;  %vm1005_vm3 = vcmask 130048   ;;  %vm1148_vm4 = vcmask 1043456   ;;  %s2903_s4 = sld [smem:[#allocation29_spill]] }
  0x55   : > { %1921 = vmatpush3.bf16.msra.mxu0 %v2129_v1  ;;  %1924 = vmatprep.mubr.msk.bf16.mxu0 %vm2314_vm1, %v2313_v2  ;;  %v660_v7 = vpack.c.bf16 %v2590_v6, %v2590_v6  ;;  %v2133_v8 = vld [vmem:[%s2539_s13] sm:$0xff]   ;;  %v2135_v10 = vld [vmem:[%s2539_s13 + $0x8] sm:$0xff]   ;;  %v2136_v11 = vld [vmem:[%s2539_s13 + $0x18] sm:$0xff]   ;;  %v1099_v52 = vshrl.u32 %v1098_v50, 7  ;;  %v2315_v54 = vmov 0   ;;  %v1101_v56 = vand.u32 127, %v1098_v50 }
  0x56   : > { %1929 = vmatpush3.bf16.msra.mxu1 %v2130_v3  ;;  %1922 = vmatprep.subr.bf16.mxu0 %v2313_v2  ;;  %v2137_v12 = vld [vmem:[%s2544_s15] sm:$0xff]   ;;  %v2138_v13 = vld [vmem:[%s2544_s15 + $0x10] sm:$0xff]   ;;  %v2139_v14 = vld [vmem:[%s2544_s15 + $0x8] sm:$0xff]   ;;  %vm1116_vm9 = vcmask 64512   ;;  %s2905_s13 = sld [smem:[#allocation27_spill]]  ;;  %vm1470_vm10 = vcmask 523264  }
  0x57   : > { %1930 = vmatprep.subr.bf16.mxu1 %v2313_v2  ;;  %1932 = vmatprep.mubr.msk.bf16.mxu1 %vm2314_vm1, %v2313_v2  ;;  %v2140_v15 = vld [vmem:[%s2544_s15 + $0x18] sm:$0xff]   ;;  %v1108_v53 = vsub.s32 0, %v1099_v52  ;;  %vm1102_vm6 = vcmp.gt.s32.totalorder %v1101_v56, %v1099_v52  ;;  %v2143_v56 = vld [vmem:[%s2563_s26] sm:$0xff]   ;;  %s2906_s15 = sld [smem:[#allocation34_spill]]  ;;  %p1867_p8 = scmp.ne.s32.totalorder %s2295_s14, 1 }
  0x59   : > { %1923 = vmatpush3.bf16.msra.mxu0 %v2131_v4 }
  0x5a   : > { %1931 = vmatpush3.bf16.msra.mxu1 %v2132_v5  ;;  %1936 = vmatprep.subr.bf16.mxu0 %v2313_v2  ;;  %s2904_s5 = scalar_lea.vmem %s2903_s4, %s2519_s24 }
  0x5b   : > { %1944 = vmatprep.subr.bf16.mxu1 %v2313_v2  ;;  %v1103_v51 = vld [vmem:[%s2904_s5] sm:$0x1] }
  0x5c   : > { %1925 = vmatmul.mubr.msk.bf16.vlgmr.msra.gmra.mrb[0].mxu0 %vm681_vm2, %v660_v7  ;;  %vm1104_vm5 = vcmp.gt.f32.partialorder %v1103_v51, 0.0 }
  0x5d   : > { %1933 = vmatmul.mubr.msk.bf16.vlgmr.msra.gmra.mrb[0].mxu1 %vm681_vm2, %v660_v7  ;;  %1937 = vmatpush3.bf16.msra.mxu0 %v2133_v8  ;;  %v1105_v55 = vsel %vm1104_vm5, 1, %v2315_v54  ;;  %s2907_s16 = scalar_lea.vmem %s2906_s15, %s2522_s19 }
  0x5e   : > { %1945 = vmatpush3.bf16.msra.mxu1 %v2134_v9  ;;  %1938 = vmatprep.subr.bf16.mxu0 %v2313_v2  ;;  %v1109_v57 = vrot.slane %v1105_v55, %v1108_v53 }
  0x5f   : > { %1946 = vmatprep.subr.bf16.mxu1 %v2313_v2  ;;  %1940 = vmatprep.mubr.msk.bf16.mxu0 %vm2314_vm1, %v2313_v2 }
  0x60   : > { %1948 = vmatprep.mubr.msk.bf16.mxu1 %vm2314_vm1, %v2313_v2  ;;  %vm1110_vm7 = vcmp.eq.s32.totalorder %v1109_v57, 1  ;;  %v2144_v57 = vld [vmem:[%s2563_s26 + $0x8] sm:$0xff]  }
  0x61   : > { %1939 = vmatpush3.bf16.msra.mxu0 %v2135_v10  ;;  %vm1111_vm8 = vmor %vm1102_vm6, %vm1110_vm7 }
  0x62   : > { %1947 = vmatpush3.bf16.msra.mxu1 %v2136_v11  ;;  %1952 = vmatprep.subr.bf16.mxu0 %v2313_v2 }
  0x63   : > { %1960 = vmatprep.subr.bf16.mxu1 %v2313_v2 }
  0x64   : > { %1941 = vmatmul.mubr.msk.bf16.vlgmr.msra.gmra.mrb[4].mxu0 %vm681_vm2, %v660_v7 }
  0x65   : > { %1949 = vmatmul.mubr.msk.bf16.vlgmr.msra.gmra.mrb[4].mxu1 %vm681_vm2, %v660_v7  ;;  %1953 = vmatpush3.bf16.msra.mxu0 %v2137_v12 }
  0x66   : > { %1961 = vmatpush3.bf16.msra.mxu1 %v2138_v13  ;;  %1954 = vmatprep.subr.bf16.mxu0 %v2313_v2 }
  0x67   : > { %1962 = vmatprep.subr.bf16.mxu1 %v2313_v2  ;;  %1956 = vmatprep.mubr.msk.bf16.mxu0 %vm2314_vm1, %v2313_v2 }
  0x68   : > { %1964 = vmatprep.mubr.msk.bf16.mxu1 %vm2314_vm1, %v2313_v2 }
  0x69   : > { %1955 = vmatpush3.bf16.msra.mxu0 %v2139_v14 }
  0x6a   : > { %1963 = vmatpush3.bf16.msra.mxu1 %v2140_v15  ;;  %1968 = vmatprep.subr.bf16.mxu0 %v2313_v2 }
  0x6b   : > { %1974 = vmatprep.subr.bf16.mxu1 %v2313_v2 }
  0x6c   : > { %1957 = vmatmul.mubr.msk.bf16.vlgmr.msra.gmra.mrb[8].mxu0 %vm681_vm2, %v660_v7 }
  0x6d   : > { %1965 = vmatmul.mubr.msk.bf16.vlgmr.msra.gmra.mrb[8].mxu1 %vm681_vm2, %v660_v7  ;;  %1970 = vmatprep.mubr.msk.bf16.mxu0 %vm2314_vm1, %v2313_v2 }
  0x6e   : > { %1976 = vmatprep.mubr.msk.bf16.mxu1 %vm2314_vm1, %v2313_v2 }
 0x12f   : > { %v719_v16 = vpop.f32.mrb[0].mxu0 }
 0x130   : > { %v1926_v17 = vpop.f32.mrb[1].mxu0  ;;  %v771_v18 = vpop.f32.mrb[0].mxu1  ;;  %v1001_v36 = vpack.c.bf16 %v719_v16, %v719_v16 }
 0x131   : > { %v722_v19 = vpop.f32.mrb[2].mxu0  ;;  %v1934_v20 = vpop.f32.mrb[1].mxu1  ;;  %v1002_v37 = vpack.c.bf16 %v771_v18, %v771_v18 }
 0x132   : > { %v1927_v21 = vpop.f32.mrb[3].mxu0  ;;  %v774_v22 = vpop.f32.mrb[2].mxu1 }
 0x133   : > { %v1935_v23 = vpop.f32.mrb[3].mxu1 }
 0x137   : > { %v831_v24 = vpop.f32.mrb[4].mxu0 }
 0x138   : > { %v1003_v25 = vpack.c.bf16 %v831_v24, %v831_v24  ;;  %v883_v26 = vpop.f32.mrb[4].mxu1  ;;  %v1942_v27 = vpop.f32.mrb[5].mxu0 }
 0x139   : > { %v1004_v28 = vpack.c.bf16 %v883_v26, %v883_v26  ;;  %v834_v29 = vpop.f32.mrb[6].mxu0  ;;  %v1950_v30 = vpop.f32.mrb[5].mxu1  ;;  %v2141_v26 = vld [vmem:[%s2905_s13] sm:$0xff]   ;;  %v2142_v27 = vld [vmem:[%s2905_s13 + $0x8] sm:$0xff]  }
 0x13a   : > { %v1010_v31 = vsel %vm1005_vm3, %v1003_v25, 0  ;;  %v1943_v32 = vpop.f32.mrb[7].mxu0  ;;  %v886_v33 = vpop.f32.mrb[6].mxu1 }
 0x13b   : > { %v1056_v34 = vsel %vm1005_vm3, %v1004_v28, 0  ;;  %v1951_v35 = vpop.f32.mrb[7].mxu1  ;;  %1969 = vmatpush3.bf16.xpose.msra.mxu0 %v1010_v31 }
 0x13c   : > { %1975 = vmatpush3.bf16.xpose.msra.mxu1 %v1056_v34  ;;  %1980 = vmatprep.subr.bf16.mxu0 %v2313_v2 }
 0x13d   : > { %1986 = vmatprep.subr.bf16.mxu1 %v2313_v2 }
 0x13f   : > { %v943_v38 = vpop.f32.mrb[8].mxu0 }
 0x140   : > { %v995_v39 = vpop.f32.mrb[8].mxu1  ;;  %v1143_v40 = vpack.c.bf16 %v943_v38, %v943_v38  ;;  %v1958_v41 = vpop.f32.mrb[9].mxu0 }
 0x141   : > { %v1144_v42 = vpack.c.bf16 %v995_v39, %v995_v39  ;;  %v1966_v43 = vpop.f32.mrb[9].mxu1  ;;  %v946_v44 = vpop.f32.mrb[10].mxu0 }
 0x142   : > { %1971 = vmatmul.mubr.msk.bf16.vlgmr.msra.gmra.mrb[12].mxu0 %vm1005_vm3, %v1001_v36  ;;  %v998_v45 = vpop.f32.mrb[10].mxu1  ;;  %v1150_v46 = vsel %vm1148_vm4, %v1143_v40, 0  ;;  %v1959_v47 = vpop.f32.mrb[11].mxu0 }
 0x143   : > { %1977 = vmatmul.mubr.msk.bf16.vlgmr.msra.gmra.mrb[12].mxu1 %vm1005_vm3, %v1002_v37  ;;  %1982 = vmatprep.mubr.msk.bf16.mxu0 %vm2314_vm1, %v2313_v2  ;;  %v1196_v48 = vsel %vm1148_vm4, %v1144_v42, 0  ;;  %v1967_v49 = vpop.f32.mrb[11].mxu1 }
 0x144   : > { %1988 = vmatprep.mubr.msk.bf16.mxu1 %vm2314_vm1, %v2313_v2  ;;  %1981 = vmatpush3.bf16.msra.mxu0 %v1150_v46 }
 0x145   : > { %1987 = vmatpush3.bf16.msra.mxu1 %v1196_v48  ;;  %1992 = vmatprep.subr.bf16.mxu0 %v2313_v2 }
 0x146   : > { %1998 = vmatprep.subr.bf16.mxu1 %v2313_v2 }
 0x215   : > { %v1046_v58 = vpop.f32.mrb[12].mxu0 }
 0x216   : > { %v1114_v59 = vsel %vm1111_vm8, -1e+09, %v1046_v58  ;;  %v1092_v60 = vpop.f32.mrb[12].mxu1  ;;  %v1972_v61 = vpop.f32.mrb[13].mxu0  ;;  %v2146_v58 = vld [vmem:[%s2568_s1 + $0x8] sm:$0xff]  }
 0x217   : > { %v1978_v62 = vpop.f32.mrb[13].mxu1  ;;  %v1049_v63 = vpop.f32.mrb[14].mxu0  ;;  %v1117_v0 = vsel %vm1116_vm9, %v1114_v59, -inf  ;;  %v1115_v1 = vsel %vm1111_vm8, -1e+09, %v1092_v60 }
 0x218   : > { %v1095_v3 = vpop.f32.mrb[14].mxu1  ;;  %1118 = vmax.xlane.f32.xlu0 %v1117_v0  ;;  %v1973_v4 = vpop.f32.mrb[15].mxu0  ;;  %v1120_v7 = vsel %vm1116_vm9, %v1115_v1, -inf  ;;  %v1855_v0 = vld [vmem:[%s2907_s16] ss:$0 sm:$0xff] }
 0x219   : > { %v1979_v5 = vpop.f32.mrb[15].mxu1  ;;  %v1856_v3 = vld [vmem:[%s634_s10] ss:$0 sm:$0xff] }
 0x21c   : > { %1121 = vmax.xlane.f32.xlu0 %v1120_v7 }
 0x2a5   : > { %v1119_v8 = vpop.xlane.xlu0 %1118 }
 0x2a6   : > { %v1123_v9 = vsub.f32 %v1114_v59, %v1119_v8  ;;  %v2147_v59 = vld [vmem:[%s2568_s1 + $0x10] sm:$0xff]  }
 0x2a8   : > { %v1125_v10 = vmul.f32 1.442695, %v1123_v9 }
 0x2a9   : > { %v1122_v11 = vpop.xlane.xlu0 %1121 }
 0x2aa   : > { %2149 = vpow2.f32 %v1125_v10  ;;  %v1124_v12 = vsub.f32 %v1115_v1, %v1122_v11 }
 0x2ac   : > { %v1127_v13 = vmul.f32 1.442695, %v1124_v12 }
 0x2ae   : > { %2151 = vpow2.f32 %v1127_v13 }
 0x2b4   : > { %v2150_v14 = vpop.eup %2149 }
 0x2b5   : > { %v1129_v15 = vsel %vm1116_vm9, %v2150_v14, 0.0 }
 0x2b6   : > { %1130 = vadd.xlane.f32.xlu1 %v1129_v15 }
 0x2b8   : > { %v2152_v16 = vpop.eup %2151 }
 0x2b9   : > { %v1132_v17 = vsel %vm1116_vm9, %v2152_v16, 0.0 }
 0x2ba   : > { %1133 = vadd.xlane.f32.xlu1 %v1132_v17 }
 0x343   : > { %v1131_v18 = vpop.xlane.xlu1 %1130 }
 0x344   : > { %2153 = vrcp.f32 %v1131_v18 }
 0x347   : > { %v1134_v19 = vpop.xlane.xlu1 %1133 }
 0x348   : > { %2155 = vrcp.f32 %v1134_v19 }
 0x34e   : > { %v2154_v20 = vpop.eup %2153 }
 0x34f   : > { %v1137_v21 = vmul.f32 %v2154_v20, %v2150_v14 }
 0x351   : > { %1139 = vst.msk [vmem:[%s2579_s27] sm:$0xff] %vm1116_vm9, %v1137_v21  ;;  %v1141_v22 = vpack.c.bf16 %v1137_v21, %v1137_v21 }
 0x352   : > { %v2156_v23 = vpop.eup %2155 }
 0x353   : > { %v1138_v24 = vmul.f32 %v2156_v23, %v2152_v16  ;;  %1983 = vmatmul.mubr.msk.bf16.vlgmr.msra.gmra.mrb[16].mxu0 %vm1116_vm9, %v1141_v22 }
 0x354   : > { %1994 = vmatprep.mubr.msk.bf16.mxu0 %vm2314_vm1, %v2313_v2  ;;  %1993 = vmatpush3.bf16.msra.mxu0 %v2141_v26 }
 0x355   : > { %1140 = vst.msk [vmem:[%s2579_s27 + $0x8] sm:$0xff] %vm1116_vm9, %v1138_v24  ;;  %v1142_v25 = vpack.c.bf16 %v1138_v24, %v1138_v24  ;;  %2004 = vmatprep.subr.bf16.mxu0 %v2313_v2 }
 0x357   : > { %1989 = vmatmul.mubr.msk.bf16.vlgmr.msra.gmra.mrb[16].mxu1 %vm1116_vm9, %v1142_v25 }
 0x358   : > { %2000 = vmatprep.mubr.msk.bf16.mxu1 %vm2314_vm1, %v2313_v2  ;;  %1999 = vmatpush3.bf16.msra.mxu1 %v2142_v27 }
 0x359   : > { %2012 = vmatprep.subr.bf16.mxu1 %v2313_v2 }
 0x426   : > { %v1186_v28 = vpop.f32.mrb[16].mxu0 }
 0x427   : > { %v1238_v29 = vpack.c.bf16 %v1186_v28, %v1186_v28  ;;  %v1984_v30 = vpop.f32.mrb[17].mxu0 }
 0x428   : > { %v1189_v31 = vpop.f32.mrb[18].mxu0 }
 0x429   : > { %v1985_v32 = vpop.f32.mrb[19].mxu0  ;;  %1995 = vmatmul.mubr.msk.bf16.vlgmr.msra.gmra.mrb[20].mxu0 %vm1005_vm3, %v1238_v29  ;;  %v1865_v29 = vld [vmem:[%s647_s17] ss:$0 sm:$0xff] }
 0x42a   : > { %v1232_v33 = vpop.f32.mrb[16].mxu1  ;;  %2008 = vmatprep.mubr.msk.bf16.mxu0 %vm2314_vm1, %v2313_v2  ;;  %2005 = vmatpush3.bf16.msra.mxu0 %v2143_v56  ;;  %v1866_v31 = vld [vmem:[%s650_s6] ss:$0 sm:$0xff] }
 0x42b   : > { %v1239_v34 = vpack.c.bf16 %v1232_v33, %v1232_v33  ;;  %v1990_v35 = vpop.f32.mrb[17].mxu1  ;;  %2006 = vmatprep.subr.bf16.mxu0 %v2313_v2 }
 0x42c   : > { %v1235_v36 = vpop.f32.mrb[18].mxu1 }
 0x42d   : > { %v1991_v37 = vpop.f32.mrb[19].mxu1  ;;  %2001 = vmatmul.mubr.msk.bf16.vlgmr.msra.gmra.mrb[20].mxu1 %vm1005_vm3, %v1239_v34 }
 0x42e   : > { %2020 = vmatprep.mubr.msk.bf16.mxu1 %vm2314_vm1, %v2313_v2  ;;  %2007 = vmatpush3.bf16.msra.mxu0 %v2144_v57 }
 0x4fc   : > { %v1287_v38 = vpop.f32.mrb[20].mxu0 }
 0x4fd   : > { %v1996_v39 = vpop.f32.mrb[21].mxu0  ;;  %v1342_v43 = vsel %vm681_vm2, %v1287_v38, 0.0 }
 0x4fe   : > { %v1290_v40 = vpop.f32.mrb[22].mxu0 }
 0x4ff   : > { %v1997_v41 = vpop.f32.mrb[23].mxu0 }
 0x500   : > { %v1336_v42 = vpop.f32.mrb[20].mxu1 }
 0x501   : > { %v1343_v44 = vsel %vm681_vm2, %v1336_v42, 0.0  ;;  %v2002_v45 = vpop.f32.mrb[21].mxu1 }
 0x502   : > { %v1344_v46 = vadd.f32 %v1343_v44, %v1342_v43  ;;  %v1339_v47 = vpop.f32.mrb[22].mxu1 }
 0x503   : > { %v2003_v48 = vpop.f32.mrb[23].mxu1 }
 0x504   : > { %v1345_v49 = vadd.f32 %v1344_v46, %v2590_v6  ;;  %v2145_v6 = vld [vmem:[%s2568_s1] sm:$0xff]  }
 0x505   : > { %2013 = vmatpush3.bf16.msra.mxu1 %v2145_v6 }
 0x506   : > { %v1346_v50 = vsel %vm681_vm2, %v1345_v49, 0.0  ;;  %2014 = vmatprep.subr.bf16.mxu1 %v2313_v2 }
 0x507   : > { %1347 = vadd.xlane.f32.xlu0 %v1346_v50 }
 0x509   : > { %2015 = vmatpush3.bf16.msra.mxu1 %v2146_v58 }
 0x50a   : > { %2016 = vmatprep.subr.bf16.mxu1 %v2313_v2 }
 0x50d   : > { %2017 = vmatpush3.bf16.msra.mxu1 %v2147_v59 }
 0x50e   : > { %2018 = vmatprep.subr.bf16.mxu1 %v2313_v2  ;;  %v2148_v2 = vld [vmem:[%s2568_s1 + $0x18] sm:$0xff]  }
 0x511   : > { %2019 = vmatpush3.bf16.msra.mxu1 %v2148_v2 }
 0x594   : > { %v1348_v51 = vpop.xlane.xlu0 %1347 }
 0x595   : > { %v1350_v52 = vmul.f32 0.03125, %v1348_v51 }
 0x597   : > { %v1351_v53 = vsub.f32 %v1345_v49, %v1350_v52 }
 0x599   : > { %v1352_v54 = vmul.f32 %v1351_v53, %v1351_v53 }
 0x59b   : > { %v1353_v55 = vsel %vm681_vm2, %v1352_v54, 0.0 }
 0x59c   : > { %1354 = vadd.xlane.f32.xlu1 %v1353_v55 }
 0x629   : > { %v1355_v60 = vpop.xlane.xlu1 %1354 }
 0x62a   : > { %v1356_v61 = vmul.f32 0.03125, %v1355_v60 }
 0x62c   : > { %v1357_v62 = vadd.f32 1e-05, %v1356_v61 }
 0x62e   : > { %2157 = vrsqrt.f32 %v1357_v62 }
 0x638   : > { %v2158_v63 = vpop.eup %2157 }
 0x639   : > { %v1359_v1 = vmul.f32 %v2158_v63, %v1351_v53 }
 0x63b   : > { %v1367_v4 = vmul.f32 %v1855_v0, %v1359_v1 }
 0x63d   : > { %v1375_v5 = vadd.f32 %v1856_v3, %v1367_v4 }
 0x63f   : > { %v1376_v7 = vpack.c.bf16 %v1375_v5, %v1375_v5 }
 0x641   : > { %2009 = vmatmul.mubr.msk.bf16.vlgmr.msra.gmra.mrb[24].mxu0 %vm681_vm2, %v1376_v7 }
 0x714   : > { %v1430_v8 = vpop.f32.mrb[24].mxu0 }
 0x715   : > { %v1436_v9 = vmax.f32 %v1430_v8, 0.0  ;;  %v2010_v10 = vpop.f32.mrb[25].mxu0 }
 0x716   : > { %v1433_v11 = vpop.f32.mrb[26].mxu0 }
 0x717   : > { %v1437_v12 = vpack.c.bf16 %v1436_v9, %v1436_v9  ;;  %v2011_v13 = vpop.f32.mrb[27].mxu0 }
 0x719   : > { %2021 = vmatmul.mubr.msk.bf16.vlgmr.msra.gmra.mrb[24].mxu1 %vm1470_vm10, %v1437_v12 }
 0x7ec   : > { %v1508_v14 = vpop.f32.mrb[24].mxu1 }
 0x7ed   : > { %v1509_v15 = vadd.f32 %v1508_v14, %v1375_v5  ;;  %v2022_v16 = vpop.f32.mrb[25].mxu1 }
 0x7ee   : > { %v1511_v17 = vpop.f32.mrb[26].mxu1 }
 0x7ef   : > { %v2023_v18 = vpop.f32.mrb[27].mxu1  ;;  %v1514_v19 = vsel %vm681_vm2, %v1509_v15, 0.0 }
 0x7f0   : > { %1515 = vadd.xlane.f32.xlu0 %v1514_v19 }
 0x87d   : > { %v1516_v20 = vpop.xlane.xlu0 %1515 }
 0x87e   : > { %v1517_v21 = vmul.f32 0.03125, %v1516_v20 }
 0x880   : > { %v1518_v22 = vsub.f32 %v1509_v15, %v1517_v21 }
 0x882   : > { %v1519_v23 = vmul.f32 %v1518_v22, %v1518_v22 }
 0x884   : > { %v1520_v24 = vsel %vm681_vm2, %v1519_v23, 0.0 }
 0x885   : > { %1521 = vadd.xlane.f32.xlu1 %v1520_v24 }
 0x912   : > { %v1522_v25 = vpop.xlane.xlu1 %1521 }
 0x913   : > { %v1523_v26 = vmul.f32 0.03125, %v1522_v25 }
 0x915   : > { %v1524_v27 = vadd.f32 1e-05, %v1523_v26 }
 0x917   : > { %2159 = vrsqrt.f32 %v1524_v27 }
 0x921   : > { %v2160_v28 = vpop.eup %2159 }
 0x922   : > { %v1526_v30 = vmul.f32 %v2160_v28, %v1518_v22  ;;  %1547 = sbr.rel (%p1867_p8) target bundleno = 2345 (0x929), region = 76 }
 0x924   : > { %v1534_v32 = vmul.f32 %v1865_v29, %v1526_v30 }
 0x926   : > { %v1542_v33 = vadd.f32 %v1866_v31, %v1534_v32 }
 0x928   : > { %1543 = vst.msk [vmem:[#allocation2] sm:$0xff] %vm681_vm2, %v1542_v33  ;;  %1548 = vst.msk [vmem:[%s594_s0] sm:$0xff] (!%p1867_p8), %vm681_vm2, %v1542_v33 }
 0x929 PF: > { %s2910_s29 = sld [smem:[#allocation15_spill]]  ;;  %s2911_s17 = sld [smem:[#allocation13_spill]] }
 0x92a   : > { %s2913_s6 = sld [smem:[#allocation38_spill]]  ;;  %s1568_s2 = sshll.u32 %s594_s0, 4  ;;  %s1569_s2 = int_to_ptr.vmem [resolvable:$true] %s1568_s2 }
 0x92b   : > { %s2161_s5 = scalar_lea.vmem %s1569_s2, 128  ;;  %s2316_s13 = smov [#allocation3]  }
 0x92c   : > { %p2162_p9 = scmp.ne.s32.totalorder %s1569_s2, %s2161_s5  ;;  %s2165_s25 = sshll.u32 %s2316_s13, 4  ;;  %s2166_s25 = int_to_ptr.vmem [resolvable:$false] %s2165_s25 }
 0x92d   : > { %s2167_s30 = scalar_lea.vmem %s2166_s25, 256  ;;  %p2168_p0 = scmp.lt.s32.totalorder %s1569_s2, %s2166_s25 }
 0x92e   : > { %p2163_p10 = pnand %p2162_p9, %p2461_p3  ;;  %p2169_p1 = scmp.lt.s32.totalorder %s2167_s30, %s2161_s5 }
 0x92f   : > { %s1870_s12 = sshll.u32 %s2910_s29, 7  ;;  %s2914_s3 = sand.u32 1, %s2911_s17  }
 0x930   : > { %s2718_s20 = scalar_lea.hbm %s2913_s6, %s1870_s12  ;;  %s1550_s4 = scalar_lea.sflag [#allocation4], %s2914_s3 }
 0x931   : > { %p2164_p11 = pneg %p2163_p10  ;;  %p2170_p4 = por %p2169_p1, %p2168_p0 }
 0x933   : > { %p2171_p2 = pnand %p2170_p4, %p2164_p11 }
 0x935   : > { %2174 = shalt.err (!%p2171_p2)
}
 0x936   : > { %s2175_s28 = scalar_lea.hbm %s2718_s20, 128  ;;  %s2179_s16 = scalar_lea.hbm %s2913_s6, 256 }
 0x937   : > { %p2176_p5 = scmp.ne.s32.totalorder %s2718_s20, %s2175_s28  ;;  %p2180_p9 = scmp.lt.u32.totalorder %s2718_s20, %s2913_s6 }
 0x938   : > { %p2181_p10 = scmp.lt.u32.totalorder %s2179_s16, %s2175_s28  ;;  %p2183_p0 = scmp.lt.u32.totalorder %s2175_s28, %s2718_s20 }
 0x939   : > { %p2177_p6 = pnand %p2176_p5, %p2461_p3 }
 0x93a   : > { %p2182_p11 = por %p2181_p10, %p2180_p9 }
 0x93b   : > { %p2178_p8 = pneg %p2177_p6 }
 0x93c   : > { %p2184_p1 = por %p2183_p0, %p2182_p11 }
 0x93e   : > { %p2185_p4 = pnand %p2184_p1, %p2178_p8 }
 0x940   : > { %2188 = shalt.err (!%p2185_p4)
}
 0x941   : > { %s2915_s1 = sld [smem:[#allocation10_spill]]  ;;  %s1871_s9 = sshll.u32 %s2910_s29, 1 }
 0x942   : > { %2024 = dma.vmem_to_hbm [thread:$0]  (%p2461_p3), %s1569_s2, 128, %s2718_s20, %s1550_s4  }
 0x943   : > { %s1872_s10 = sshll.u32 %s2295_s14, 2  ;;  %s1583_s26 = sshll.u32 %s2579_s27, 4  ;;  %s2744_s26 = int_to_ptr.vmem [resolvable:$true] %s1583_s26 }
 0x944   : > { %s1580_s18 = sadd.s32 %s1872_s10, %s1871_s9  ;;  %s2917_s19 = sld [smem:[#allocation39_spill]] }
 0x945   : > { %s1873_s17 = sshll.u32 %s1580_s18, 7  ;;  %s2189_s13 = scalar_lea.vmem %s2744_s26, 256 }
 0x946   : > { %p2190_p3 = scmp.ne.s32.totalorder %s2744_s26, %s2189_s13  ;;  %s2317_s14 = smov [#allocation5]  }
 0x947   : > { %s2918_s3 = sand.u32 1, %s2915_s1   ;;  %s2193_s27 = sshll.u32 %s2317_s14, 4  ;;  %s2194_s27 = int_to_ptr.vmem [resolvable:$false] %s2193_s27 }
 0x948   : > { %s2753_s5 = scalar_lea.sflag [#allocation6], %s2918_s3  ;;  %p2191_p2 = pnand %p2190_p3, %p2490_p12 }
 0x949   : > { %s2195_s29 = scalar_lea.vmem %s2194_s27, 512  ;;  %p2196_p6 = scmp.lt.s32.totalorder %s2744_s26, %s2194_s27 }
 0x94a   : > { %s2749_s11 = scalar_lea.hbm %s2917_s19, %s1873_s17  ;;  %p2192_p5 = pneg %p2191_p2 }
 0x94b   : > { %p2197_p8 = scmp.lt.s32.totalorder %s2195_s29, %s2189_s13 }
 0x94d   : > { %p2198_p9 = por %p2197_p8, %p2196_p6 }
 0x94f   : > { %p2199_p10 = pnand %p2198_p9, %p2192_p5 }
 0x951   : > { %2202 = shalt.err (!%p2199_p10)
}
 0x952   : > { %s2203_s20 = scalar_lea.hbm %s2749_s11, 256  ;;  %s2207_s25 = scalar_lea.hbm %s2917_s19, 1024 }
 0x953   : > { %p2204_p11 = scmp.ne.s32.totalorder %s2749_s11, %s2203_s20  ;;  %p2208_p4 = scmp.lt.u32.totalorder %s2749_s11, %s2917_s19 }
 0x954   : > { %p2209_p3 = scmp.lt.u32.totalorder %s2207_s25, %s2203_s20  ;;  %p2211_p5 = scmp.lt.u32.totalorder %s2203_s20, %s2749_s11 }
 0x955   : > { %p2205_p0 = pnand %p2204_p11, %p2490_p12 }
 0x956   : > { %p2210_p2 = por %p2209_p3, %p2208_p4 }
 0x957   : > { %p2206_p1 = pneg %p2205_p0 }
 0x958   : > { %p2212_p6 = por %p2211_p5, %p2210_p2 }
 0x95a   : > { %p2213_p8 = pnand %p2212_p6, %p2206_p1 }
 0x95c   : > { %2216 = shalt.err (!%p2213_p8)
}
 0x95d   : > { %s2318_s0 = smov 128   ;;  %s2319_s15 = smov 8  }
 0x95e   : > { %2025 = dma.vmem_to_hbm [thread:$0]  (%p2490_p12), %s2744_s26, 256, %s2749_s11, %s2753_s5, %s2318_s0, %s2318_s0, %s2319_s15  }
 0x95f PF: > { %s2919_s16 = sld [smem:[#allocation18_spill]]  ;;  %s2920_s23 = sld [smem:[#allocation12_spill]] }
 0x965   : > { %p2035_p9 = scmp.ge.s32.totalorder %s2919_s16, 2  ;;  %s1598_s1 = sand.u32 1, %s2920_s23  }
 0x966   : > { %s1599_s9 = scalar_lea.sflag [#allocation4], %s1598_s1 }
 0x967   : > { %p2029_p10 = pnand %p2035_p9, %p2478_p7 }
 0x969   : > { %2262 = dma.done.wait (!%p2029_p10), %s1599_s9, 128  }
 0x96a   : > { %2264 = vsyncadd (!%p2029_p10), %s1599_s9, 4294967168  ;;  %s2922_s10 = sld [smem:[#allocation9_spill]]  ;;  %p2032_p11 = pnand %p2035_p9, %p2502_p13 }
 0x970   : > { %s1607_s17 = sand.u32 1, %s2922_s10  }
 0x971   : > { %s1608_s12 = scalar_lea.sflag [#allocation6], %s1607_s17 }
 0x972   : > { %2266 = dma.done.wait (!%p2032_p11), %s1608_s12, 256  }
 0x973   : > { %2268 = vsyncadd (!%p2032_p11), %s1608_s12, 4294967040  ;;  %s30_s18 = sadd.s32 1, %s2919_s16   ;;  %s2924_s25 = sld [smem:[#allocation10_spill]] }
 0x974   : > { %p27_p12 = scmp.ge.s32.totalorder %s30_s18, 6   ;;  %s2925_s26 = sld [smem:[#allocation11_spill]] }
 0x975   : > { %s2926_s27 = sld [smem:[#allocation25_spill]]  ;;  %s2927_s28 = sld [smem:[#allocation13_spill]] }
 0x976   : > { %s2928_s29 = sld [smem:[#allocation14_spill]]  ;;  %s2929_s30 = sld [smem:[#allocation24_spill]] }
 0x977   : > { %s2930_s14 = sld [smem:[#allocation16_spill]]  ;;  %s2931_s15 = sld [smem:[#allocation17_spill]] }
 0x978   : > { %s2932_s16 = sld [smem:[#allocation19_spill]]  ;;  %s2933_s17 = sld [smem:[#allocation21_spill]] }
 0x979   :  { %29 = sbr.rel (!%p27_p12) target bundleno = 22 (0x16), region = 161 }
 0x980   :  { %1613 = vsyncpa [#allocation4], 1 }
 0x981   :  { %1615 = vsyncpa [#allocation4 + $0x1], 1 }
 0x982   :  { %1616 = vsyncpa [#allocation6], 1 }
 0x983   :  { %1618 = vsyncpa [#allocation6 + $0x1], 1 }

</bundles_post_ra>
